<compile_context>
chip_gen: v7x
topology: tpu7x:2x2x1
jax: 0.10.0
libtpu: 0.0.40
codegen_flags: <defaults>
</compile_context>

<pallas_src>
import jax
import jax.numpy as jnp
from jax.experimental import pallas as pl
from jax.experimental.pallas import tpu as pltpu


def _round_up(x, m):
    return ((x + m - 1) // m) * m


def _softplus(x):
    # Matches torch.nn.Softplus(beta=1, threshold=20):
    #   softplus(x) = x              if x > 20
    #               = log1p(exp(x))  otherwise   (min-clamp avoids exp overflow)
    return jnp.where(x > 20.0, x, jnp.log1p(jnp.exp(jnp.minimum(x, 20.0))))


def _vencoder_kernel(x_ref, w1_ref, b1_ref, w2_ref, b2_ref, w3_ref, b3_ref,
                     loc_ref, scale_ref):
    # Layer 1: [TB, Fp](bf16) @ [Fp, Hp](bf16) -> f32 acc, + bias, softplus (f32).
    h = jnp.dot(x_ref[...], w1_ref[...], preferred_element_type=jnp.float32)
    h = _softplus(h + b1_ref[...])
    h_bf16 = h.astype(jnp.bfloat16)

    # loc head: [TB, Hp] @ [Hp, Lp] -> f32
    loc = jnp.dot(h_bf16, w2_ref[...], preferred_element_type=jnp.float32)
    loc_ref[...] = loc + b2_ref[...]

    # scale head: exp of the linear output (f32 EUP exp).
    log_scale = jnp.dot(h_bf16, w3_ref[...], preferred_element_type=jnp.float32)
    scale_ref[...] = jnp.exp(log_scale + b3_ref[...])


def prepare_vencoder_params(w1_t, b1, w2_t, b2, w3_t, b3):
    """Pad once to lane-aligned shapes and cast matmul weights to bf16.

    Weights are stored pre-transposed as [in_features, out_features]; biases 1-D.
    Zero padding is exact: padded K rows contribute 0 to every dot product and
    the spurious softplus(0) values in padded hidden columns are killed by the
    zero rows of W2/W3.
    """
    F, H = w1_t.shape
    L = w2_t.shape[1]
    Fp, Hp, Lp = _round_up(F, 128), _round_up(H, 128), _round_up(L, 128)

    def pad_w(w, rows, cols):
        out = jnp.zeros((rows, cols), jnp.float32)
        return out.at[: w.shape[0], : w.shape[1]].set(w)

    def pad_b(b, cols):
        out = jnp.zeros((1, cols), jnp.float32)
        return out.at[0, : b.shape[-1]].set(b.reshape(-1))

    return dict(
        F=F, H=H, L=L, Fp=Fp, Hp=Hp, Lp=Lp,
        w1=pad_w(w1_t, Fp, Hp).astype(jnp.bfloat16),
        b1=pad_b(b1, Hp),
        w2=pad_w(w2_t, Hp, Lp).astype(jnp.bfloat16),
        b2=pad_b(b2, Lp),
        w3=pad_w(w3_t, Hp, Lp).astype(jnp.bfloat16),
        b3=pad_b(b3, Lp),
    )


def vencoder_forward(x, params, *, block_b=1024):
    """x: [..., F] (reshaped to [-1, F] like the module) -> (loc [B, L], scale [B, L])."""
    F, L = params["F"], params["L"]
    Fp, Hp, Lp = params["Fp"], params["Hp"], params["Lp"]

    x = jnp.asarray(x, jnp.float32).reshape(-1, F)
    B = x.shape[0]

    # Batch tile: multiple of 16 (bf16 sublane packing). With TB=1024, double-
    # buffered x/loc/scale blocks are ~5.5 MiB total — safely under the default
    # 32 MiB scoped VMEM on v5e/v6e and on v7x (64 MiB physical).
    TB = min(block_b, _round_up(B, 16))
    Bp = _round_up(B, TB)
    grid = (Bp // TB,)

    x_pad = jnp.zeros((Bp, Fp), jnp.bfloat16).at[:B, :F].set(x.astype(jnp.bfloat16))

    batch = lambda i: (i, 0)   # batch-tiled arrays
    bcast = lambda i: (0, 0)   # weights / biases: single resident block

    flops = 2 * Bp * (Fp * Hp + 2 * Hp * Lp)
    transcendentals = Bp * (2 * Hp + Lp)          # softplus: exp+log1p; scale: exp
    bytes_accessed = (
        Bp * Fp * 2                               # x (bf16)
        + (Fp * Hp + 2 * Hp * Lp) * 2             # weights (bf16)
        + (Hp + 2 * Lp) * 4                       # biases (f32)
        + 2 * Bp * Lp * 4                         # loc + scale (f32)
    )

    loc_p, scale_p = pl.pallas_call(
        _vencoder_kernel,
        grid=grid,
        in_specs=[
            pl.BlockSpec((TB, Fp), batch),        # x
            pl.BlockSpec((Fp, Hp), bcast),        # W1^T (bf16)
            pl.BlockSpec((1, Hp), bcast),         # b1
            pl.BlockSpec((Hp, Lp), bcast),        # W2^T (bf16)
            pl.BlockSpec((1, Lp), bcast),         # b2
            pl.BlockSpec((Hp, Lp), bcast),        # W3^T (bf16)
            pl.BlockSpec((1, Lp), bcast),         # b3
        ],
        out_specs=(
            pl.BlockSpec((TB, Lp), batch),        # loc  (lane-dense, unmasked stores)
            pl.BlockSpec((TB, Lp), batch),        # scale
        ),
        out_shape=(
            jax.ShapeDtypeStruct((Bp, Lp), jnp.float32),
            jax.ShapeDtypeStruct((Bp, Lp), jnp.float32),
        ),
        compiler_params=pltpu.CompilerParams(
            dimension_semantics=("parallel",),
        ),
        cost_estimate=pl.CostEstimate(
            flops=flops,
            transcendentals=transcendentals,
            bytes_accessed=bytes_accessed,
        ),
    )(x_pad, params["w1"], params["b1"], params["w2"], params["b2"],
      params["w3"], params["b3"])

    return loc_p[:B, :L], scale_p[:B, :L]


def _torch_linear_init(key, fan_in, fan_out):
    """Mimics torch.nn.Linear default init (uniform +/- 1/sqrt(fan_in)).

    Returns weight pre-transposed as [in, out] and bias as [out]."""
    kw, kb = jax.random.split(key)
    bound = 1.0 / jnp.sqrt(jnp.float32(fan_in))
    w_t = jax.random.uniform(kw, (fan_in, fan_out), jnp.float32, -bound, bound)
    b = jax.random.uniform(kb, (fan_out,), jnp.float32, -bound, bound)
    return w_t, b


def _reference_forward_bf16(x, w1_t, b1, w2_t, b2, w3_t, b3):
    """Pure-JAX reference with the same bf16-matmul / f32-accumulate numerics."""
    x = x.reshape(-1, w1_t.shape[0]).astype(jnp.float32)
    h = jnp.dot(x.astype(jnp.bfloat16), w1_t.astype(jnp.bfloat16),
                preferred_element_type=jnp.float32) + b1
    h = _softplus(h)
    hb = h.astype(jnp.bfloat16)
    loc = jnp.dot(hb, w2_t.astype(jnp.bfloat16),
                  preferred_element_type=jnp.float32) + b2
    scale = jnp.exp(jnp.dot(hb, w3_t.astype(jnp.bfloat16),
                            preferred_element_type=jnp.float32) + b3)
    return loc, scale


def _reference_forward_f32(x, w1_t, b1, w2_t, b2, w3_t, b3):
    """Full-f32 reference matching the original torch module semantics."""
    x = x.reshape(-1, w1_t.shape[0]).astype(jnp.float32)
    h = _softplus(x @ w1_t + b1)
    return h @ w2_t + b2, jnp.exp(h @ w3_t + b3)


if __name__ == "__main__":
    # Small shapes consistent with the module: MNIST-like 28x28 input -> 784
    # features, hidden=64, latent=16, batch=8.
    B, n_input, n_hidden, n_latent = 8, 784, 64, 16

    key = jax.random.PRNGKey(0)
    kx, k1, k2, k3 = jax.random.split(key, 4)

    x = jax.random.normal(kx, (B, 28, 28), jnp.float32)  # forward reshapes to [-1, 784]
    w1_t, b1 = _torch_linear_init(k1, n_input, n_hidden)
    w2_t, b2 = _torch_linear_init(k2, n_hidden, n_latent)
    w3_t, b3 = _torch_linear_init(k3, n_hidden, n_latent)

    params = prepare_vencoder_params(w1_t, b1, w2_t, b2, w3_t, b3)

    loc, scale = vencoder_forward(x, params)
    loc, scale = jax.block_until_ready((loc, scale))

    assert loc.shape == (B, n_latent) and scale.shape == (B, n_latent)

    # Precision-matched (bf16 matmul / f32 accumulate) reference: tight tolerance.
    loc_ref, scale_ref = _reference_forward_bf16(x, w1_t, b1, w2_t, b2, w3_t, b3)
    assert jnp.allclose(loc, loc_ref, atol=1e-3, rtol=1e-3), "loc mismatch vs bf16 reference"
    assert jnp.allclose(scale, scale_ref, atol=1e-3, rtol=1e-3), "scale mismatch vs bf16 reference"

    # Module-semantics (full f32) reference: loose tolerance for bf16 matmul inputs.
    loc32, scale32 = _reference_forward_f32(x, w1_t, b1, w2_t, b2, w3_t, b3)
    assert jnp.allclose(loc, loc32, atol=5e-2, rtol=5e-2), "loc mismatch vs f32 reference"
    assert jnp.allclose(scale, scale32, atol=5e-2, rtol=5e-2), "scale mismatch vs f32 reference"

    print("KERNEL_OK")
</pallas_src>

<mosaic_0001>
module attributes {stable_mosaic.version = 11 : i64} {
  func.func @_vencoder_kernel(%arg0: i32, %arg1: memref<16x896xbf16, #tpu.memory_space<vmem>>, %arg2: memref<896x128xbf16, #tpu.memory_space<vmem>>, %arg3: memref<1x128xf32, #tpu.memory_space<vmem>>, %arg4: memref<128x128xbf16, #tpu.memory_space<vmem>>, %arg5: memref<1x128xf32, #tpu.memory_space<vmem>>, %arg6: memref<128x128xbf16, #tpu.memory_space<vmem>>, %arg7: memref<1x128xf32, #tpu.memory_space<vmem>>, %arg8: memref<16x128xf32, #tpu.memory_space<vmem>>, %arg9: memref<16x128xf32, #tpu.memory_space<vmem>>) attributes {dimension_semantics = [#tpu.dimension_semantics<parallel>], iteration_bounds = array<i64: 1>, scalar_prefetch = 0 : i64, scratch_operands = 0 : i64, tpu.core_type = #tpu.core_type<tc>, window_params = [{transform_indices = @transform_0, window_bounds = array<i64: 16, 896>}, {pipeline_mode = #tpu.pipeline_mode<synchronous>, transform_indices = @transform_1, window_bounds = array<i64: 896, 128>}, {pipeline_mode = #tpu.pipeline_mode<synchronous>, transform_indices = @transform_2, window_bounds = array<i64: 1, 128>}, {pipeline_mode = #tpu.pipeline_mode<synchronous>, transform_indices = @transform_3, window_bounds = array<i64: 128, 128>}, {pipeline_mode = #tpu.pipeline_mode<synchronous>, transform_indices = @transform_4, window_bounds = array<i64: 1, 128>}, {pipeline_mode = #tpu.pipeline_mode<synchronous>, transform_indices = @transform_5, window_bounds = array<i64: 128, 128>}, {pipeline_mode = #tpu.pipeline_mode<synchronous>, transform_indices = @transform_6, window_bounds = array<i64: 1, 128>}, {transform_indices = @transform_7, window_bounds = array<i64: 16, 128>}, {transform_indices = @transform_8, window_bounds = array<i64: 16, 128>}]} {
    %c0 = arith.constant 0 : index
    %c0_0 = arith.constant 0 : index
    %0 = vector.load %arg1[%c0, %c0_0] : memref<16x896xbf16, #tpu.memory_space<vmem>>, vector<16x896xbf16>
    %c0_1 = arith.constant 0 : index
    %c0_2 = arith.constant 0 : index
    %1 = vector.load %arg2[%c0_1, %c0_2] : memref<896x128xbf16, #tpu.memory_space<vmem>>, vector<896x128xbf16>
    %cst = arith.constant dense<0.000000e+00> : vector<16x128xf32>
    %2 = tpu.matmul %0, %1, %cst {dimension_numbers = #tpu.dot_dimension_numbers<[1], [0], [0], [1], [0, 0, 1, 1], [], []>} : vector<16x896xbf16>, vector<896x128xbf16>, vector<16x128xf32> -> vector<16x128xf32>
    %c0_3 = arith.constant 0 : index
    %c0_4 = arith.constant 0 : index
    %3 = vector.load %arg3[%c0_3, %c0_4] : memref<1x128xf32, #tpu.memory_space<vmem>>, vector<1x128xf32>
    %4 = vector.broadcast %3 : vector<1x128xf32> to vector<16x128xf32>
    %5 = arith.addf %2, %4 : vector<16x128xf32>
    %cst_5 = arith.constant 2.000000e+01 : f32
    %6 = vector.broadcast %cst_5 : f32 to vector<16x128xf32>
    %7 = arith.cmpf ogt, %5, %6 : vector<16x128xf32>
    %cst_6 = arith.constant 2.000000e+01 : f32
    %8 = vector.broadcast %cst_6 : f32 to vector<16x128xf32>
    %9 = arith.minimumf %5, %8 : vector<16x128xf32>
    %10 = math.exp %9 : vector<16x128xf32>
    %11 = math.log1p %10 : vector<16x128xf32>
    %12 = arith.select %7, %5, %11 : vector<16x128xi1>, vector<16x128xf32>
    %13 = arith.truncf %12 : vector<16x128xf32> to vector<16x128xbf16>
    %c0_7 = arith.constant 0 : index
    %c0_8 = arith.constant 0 : index
    %14 = vector.load %arg4[%c0_7, %c0_8] : memref<128x128xbf16, #tpu.memory_space<vmem>>, vector<128x128xbf16>
    %cst_9 = arith.constant dense<0.000000e+00> : vector<16x128xf32>
    %15 = tpu.matmul %13, %14, %cst_9 {dimension_numbers = #tpu.dot_dimension_numbers<[1], [0], [0], [1], [0, 0, 1, 1], [], []>} : vector<16x128xbf16>, vector<128x128xbf16>, vector<16x128xf32> -> vector<16x128xf32>
    %c0_10 = arith.constant 0 : index
    %c0_11 = arith.constant 0 : index
    %16 = vector.load %arg5[%c0_10, %c0_11] : memref<1x128xf32, #tpu.memory_space<vmem>>, vector<1x128xf32>
    %17 = vector.broadcast %16 : vector<1x128xf32> to vector<16x128xf32>
    %18 = arith.addf %15, %17 : vector<16x128xf32>
    %c0_12 = arith.constant 0 : index
    %c0_13 = arith.constant 0 : index
    %19 = vector.load %arg8[%c0_12, %c0_13] : memref<16x128xf32, #tpu.memory_space<vmem>>, vector<16x128xf32>
    tpu.vector_store %arg8[%c0_12, %c0_13], %18 {strides = array<i32>} : memref<16x128xf32, #tpu.memory_space<vmem>>, vector<16x128xf32>,
    %c0_14 = arith.constant 0 : index
    %c0_15 = arith.constant 0 : index
    %20 = vector.load %arg6[%c0_14, %c0_15] : memref<128x128xbf16, #tpu.memory_space<vmem>>, vector<128x128xbf16>
    %cst_16 = arith.constant dense<0.000000e+00> : vector<16x128xf32>
    %21 = tpu.matmul %13, %20, %cst_16 {dimension_numbers = #tpu.dot_dimension_numbers<[1], [0], [0], [1], [0, 0, 1, 1], [], []>} : vector<16x128xbf16>, vector<128x128xbf16>, vector<16x128xf32> -> vector<16x128xf32>
    %c0_17 = arith.constant 0 : index
    %c0_18 = arith.constant 0 : index
    %22 = vector.load %arg7[%c0_17, %c0_18] : memref<1x128xf32, #tpu.memory_space<vmem>>, vector<1x128xf32>
    %23 = vector.broadcast %22 : vector<1x128xf32> to vector<16x128xf32>
    %24 = arith.addf %21, %23 : vector<16x128xf32>
    %25 = math.exp %24 : vector<16x128xf32>
    %c0_19 = arith.constant 0 : index
    %c0_20 = arith.constant 0 : index
    %26 = vector.load %arg9[%c0_19, %c0_20] : memref<16x128xf32, #tpu.memory_space<vmem>>, vector<16x128xf32>
    tpu.vector_store %arg9[%c0_19, %c0_20], %25 {strides = array<i32>} : memref<16x128xf32, #tpu.memory_space<vmem>>, vector<16x128xf32>,
    return
  }
  func.func @transform_0(%arg0: i32) -> (i32, i32) {
    %c0_i32 = arith.constant 0 : i32
    %c0_i32_0 = arith.constant 0 : i32
    return %arg0, %c0_i32 : i32, i32
  }
  func.func @transform_1(%arg0: i32) -> (i32, i32) {
    %c0_i32 = arith.constant 0 : i32
    %c0_i32_0 = arith.constant 0 : i32
    %c0_i32_1 = arith.constant 0 : i32
    return %c0_i32, %c0_i32_0 : i32, i32
  }
  func.func @transform_2(%arg0: i32) -> (i32, i32) {
    %c0_i32 = arith.constant 0 : i32
    %c0_i32_0 = arith.constant 0 : i32
    %c0_i32_1 = arith.constant 0 : i32
    return %c0_i32, %c0_i32_0 : i32, i32
  }
  func.func @transform_3(%arg0: i32) -> (i32, i32) {
    %c0_i32 = arith.constant 0 : i32
    %c0_i32_0 = arith.constant 0 : i32
    %c0_i32_1 = arith.constant 0 : i32
    return %c0_i32, %c0_i32_0 : i32, i32
  }
  func.func @transform_4(%arg0: i32) -> (i32, i32) {
    %c0_i32 = arith.constant 0 : i32
    %c0_i32_0 = arith.constant 0 : i32
    %c0_i32_1 = arith.constant 0 : i32
    return %c0_i32, %c0_i32_0 : i32, i32
  }
  func.func @transform_5(%arg0: i32) -> (i32, i32) {
    %c0_i32 = arith.constant 0 : i32
    %c0_i32_0 = arith.constant 0 : i32
    %c0_i32_1 = arith.constant 0 : i32
    return %c0_i32, %c0_i32_0 : i32, i32
  }
  func.func @transform_6(%arg0: i32) -> (i32, i32) {
    %c0_i32 = arith.constant 0 : i32
    %c0_i32_0 = arith.constant 0 : i32
    %c0_i32_1 = arith.constant 0 : i32
    return %c0_i32, %c0_i32_0 : i32, i32
  }
  func.func @transform_7(%arg0: i32) -> (i32, i32) {
    %c0_i32 = arith.constant 0 : i32
    %c0_i32_0 = arith.constant 0 : i32
    return %arg0, %c0_i32 : i32, i32
  }
  func.func @transform_8(%arg0: i32) -> (i32, i32) {
    %c0_i32 = arith.constant 0 : i32
    %c0_i32_0 = arith.constant 0 : i32
    return %arg0, %c0_i32 : i32, i32
  }
}

</mosaic_0001>

<bundles_post_ra>
// kernel: tpu_custom_call.1
= control target key start
LH: loop header
LB: loop body
LE: loop exit
PB: predicated region body
PF: predicated region fallthrough
CT: control target
= control target key end

     0   :  { %14 = vsyncpa [#allocation3], 0  ;;  %s1716_s0 = inlined_call_operand.hbm [shape: bf16[16,896], index: 0, kind: input, shape index: {}]   ;;  %s1717_s1 = inlined_call_operand.hbm [shape: bf16[896,128], index: 1, kind: input, shape index: {}]   ;;  %s1718_s2 = inlined_call_operand.vmem [shape: f32[1,128], index: 2, kind: input, shape index: {}]   ;;  %s1719_s3 = inlined_call_operand.hbm [shape: bf16[128,128], index: 3, kind: input, shape index: {}]   ;;  %s1720_s4 = inlined_call_operand.vmem [shape: f32[1,128], index: 4, kind: input, shape index: {}]   ;;  %s1721_s5 = inlined_call_operand.hbm [shape: bf16[128,128], index: 5, kind: input, shape index: {}]   ;;  %s1722_s6 = inlined_call_operand.vmem [shape: f32[1,128], index: 6, kind: input, shape index: {}]   ;;  %s1723_s7 = inlined_call_operand.hbm [shape: f32[16,128], index: 7, kind: output, shape index: {0}]   ;;  %s1724_s8 = inlined_call_operand.hbm [shape: f32[16,128], index: 8, kind: output, shape index: {1}]  }
   0x1   :  { %15 = vsyncpa [#allocation6], 0 }
   0x2   :  { %16 = vsyncpa [#allocation9], 0 }
   0x3   :  { %17 = vsyncpa [#allocation4], 0 }
   0x4   :  { %18 = vsyncpa [#allocation12], 0  ;;  %s1530_s27 = smov [#allocation5]   ;;  %s1388_s9 = scalar_lea.hbm %s1717_s1, 7168 }
   0x5   :  { %s36_s28 = sshll.u32 %s1530_s27, 4  ;;  %p1389_p0 = scmp.ne.s32.totalorder %s1717_s1, %s1388_s9  ;;  %s37_s28 = int_to_ptr.vmem [resolvable:$true] %s36_s28 }
   0x6   :  { %p1392_p1 = scmp.lt.u32.totalorder %s1388_s9, %s1717_s1 }
   0x8   :  { %p1394_p2 = pnand %p1392_p1, %p1389_p0 }
   0xa   :  { %1397 = shalt.err (!%p1394_p2)
}
   0xb   :  { %s1398_s14 = scalar_lea.vmem %s37_s28, 7168  ;;  %p1403_p4 = scmp.lt.s32.totalorder %s37_s28, %s37_s28 }
   0xc   :  { %p1399_p3 = scmp.ne.s32.totalorder %s37_s28, %s1398_s14  ;;  %p1404_p5 = scmp.lt.s32.totalorder %s1398_s14, %s1398_s14 }
   0xe   :  { %p1405_p6 = por %p1404_p5, %p1403_p4 }
  0x10   :  { %p1406_p7 = pnand %p1405_p6, %p1399_p3 }
  0x12   :  { %1409 = shalt.err (!%p1406_p7)
}
  0x13   :  { %s1531_s15 = smov 64   ;;  %s1532_s16 = smov 4  }
  0x14   :  { %42 = dma.hbm_to_vmem [thread:$0]  %s1717_s1, 7168, %s37_s28, [#allocation6], %s1531_s15, %s1531_s15, %s1532_s16  }
  0x15   :  { %s1533_s19 = smov [#allocation2]   ;;  %s1410_s23 = scalar_lea.hbm %s1716_s0, 896 }
  0x16   :  { %s24_s20 = sshll.u32 %s1533_s19, 4  ;;  %p1411_p8 = scmp.ne.s32.totalorder %s1716_s0, %s1410_s23  ;;  %s25_s20 = int_to_ptr.vmem [resolvable:$true] %s24_s20 }
  0x17   :  { %p1414_p9 = scmp.lt.u32.totalorder %s1410_s23, %s1716_s0 }
  0x19   :  { %p1416_p10 = pnand %p1414_p9, %p1411_p8 }
  0x1b   :  { %1419 = shalt.err (!%p1416_p10)
}
  0x1c   :  { %s1420_s29 = scalar_lea.vmem %s25_s20, 896  ;;  %p1425_p12 = scmp.lt.s32.totalorder %s25_s20, %s25_s20 }
  0x1d   :  { %p1421_p11 = scmp.ne.s32.totalorder %s25_s20, %s1420_s29  ;;  %p1426_p13 = scmp.lt.s32.totalorder %s1420_s29, %s1420_s29 }
  0x1f   :  { %p1427_p0 = por %p1426_p13, %p1425_p12 }
  0x21   :  { %p1428_p1 = pnand %p1427_p0, %p1421_p11 }
  0x23   :  { %1431 = shalt.err (!%p1428_p1)
}
  0x24   :  { %s1534_s1 = smov 448   ;;  %s1535_s28 = smov 28  }
  0x25   :  { %30 = dma.hbm_to_vmem [thread:$0]  %s1716_s0, 896, %s25_s20, [#allocation3], %s1534_s1, %s1534_s1, %s1535_s28  }
  0x26   :  { %s1536_s10 = smov [#allocation7]   ;;  %s1537_s12 = smov [#allocation8]  }
  0x27   :  { %s50_s11 = sshll.u32 %s1536_s10, 4  ;;  %s64_s13 = sshll.u32 %s1537_s12, 4  ;;  %s51_s11 = int_to_ptr.vmem [resolvable:$true] %s50_s11  ;;  %s1616_s13 = int_to_ptr.vmem [resolvable:$true] %s64_s13 }
  0x28   :  { %s1432_s18 = scalar_lea.hbm %s1719_s3, 1024 }
  0x29   :  { %p1433_p2 = scmp.ne.s32.totalorder %s1719_s3, %s1432_s18  ;;  %p1436_p3 = scmp.lt.u32.totalorder %s1432_s18, %s1719_s3 }
  0x2b   :  { %p1438_p4 = pnand %p1436_p3, %p1433_p2 }
  0x2d   :  { %1441 = shalt.err (!%p1438_p4)
}
  0x2e   :  { %s1442_s0 = scalar_lea.vmem %s51_s11, 1024  ;;  %p1447_p6 = scmp.lt.s32.totalorder %s51_s11, %s51_s11 }
  0x2f   :  { %p1443_p5 = scmp.ne.s32.totalorder %s51_s11, %s1442_s0  ;;  %p1448_p7 = scmp.lt.s32.totalorder %s1442_s0, %s1442_s0 }
  0x31   :  { %p1449_p8 = por %p1448_p7, %p1447_p6 }
  0x33   :  { %p1450_p9 = pnand %p1449_p8, %p1443_p5 }
  0x35   :  { %1453 = shalt.err (!%p1450_p9)
}
  0x36   :  { %56 = dma.hbm_to_vmem [thread:$0]  %s1719_s3, 1024, %s51_s11, [#allocation6], %s1531_s15, %s1531_s15, %s1532_s16  }
  0x37   :  { %s1454_s27 = scalar_lea.hbm %s1721_s5, 1024 }
  0x38   :  { %p1455_p10 = scmp.ne.s32.totalorder %s1721_s5, %s1454_s27  ;;  %p1458_p11 = scmp.lt.u32.totalorder %s1454_s27, %s1721_s5 }
  0x3a   :  { %p1460_p12 = pnand %p1458_p11, %p1455_p10 }
  0x3c   :  { %1463 = shalt.err (!%p1460_p12)
}
  0x3d   :  { %s1464_s9 = scalar_lea.vmem %s1616_s13, 1024  ;;  %p1469_p0 = scmp.lt.s32.totalorder %s1616_s13, %s1616_s13 }
  0x3e   :  { %p1465_p13 = scmp.ne.s32.totalorder %s1616_s13, %s1464_s9  ;;  %p1470_p1 = scmp.lt.s32.totalorder %s1464_s9, %s1464_s9 }
  0x40   :  { %p1471_p2 = por %p1470_p1, %p1469_p0 }
  0x42   :  { %p1472_p3 = pnand %p1471_p2, %p1465_p13 }
  0x44   :  { %1475 = shalt.err (!%p1472_p3)
}
  0x45   :  { %70 = dma.hbm_to_vmem [thread:$0]  %s1721_s5, 1024, %s1616_s13, [#allocation9], %s1531_s15, %s1531_s15, %s1532_s16  }
  0x46   :  { %1520 = dma.done.wait [#allocation3], 896  }
  0x47   :  { %1521 = vsyncadd [#allocation3], 4294966400 }
  0x48   :  { %1522 = dma.done.wait [#allocation6], 8192  }
  0x49   :  { %1523 = vsyncadd [#allocation6], 4294959104 }
  0x4a   :  { %1524 = dma.done.wait [#allocation9], 1024  }
  0x4b   :  { %1525 = vsyncadd [#allocation9], 4294966272  ;;  %v1294_v0 = vld [vmem:[#allocation5 + $0x40] sm:$0xff]   ;;  %v1298_v4 = vld [vmem:[#allocation5 + $0x48] sm:$0xff]   ;;  %v1538_v38 = vmov 0.0   ;;  %vm1539_vm0 = vmmov 0  }
  0x4c   :  { %v1295_v1 = vld [vmem:[#allocation5] sm:$0xff]   ;;  %1127 = vmatprep.subr.bf16.mxu0 %v1294_v0  ;;  %v1299_v5 = vld [vmem:[#allocation5 + $0x8] sm:$0xff]   ;;  %v1302_v8 = vld [vmem:[#allocation5 + $0x50] sm:$0xff]   ;;  %s1540_s13 = smov [#allocation10]  }
  0x4d   :  { %v1296_v2 = vld [vmem:[#allocation5 + $0xc0] sm:$0xff]   ;;  %1128 = vmatpush3.bf16.msra.mxu0 %v1295_v1  ;;  %v1300_v6 = vld [vmem:[#allocation5 + $0xc8] sm:$0xff]   ;;  %v1303_v9 = vld [vmem:[#allocation5 + $0x10] sm:$0xff]   ;;  %s1015_s14 = sshll.u32 %s1540_s13, 4  ;;  %s1016_s14 = int_to_ptr.vmem [resolvable:$true] %s1015_s14 }
  0x4e   :  { %v1297_v3 = vld [vmem:[#allocation5 + $0x80] sm:$0xff]   ;;  %1149 = vmatprep.subr.bf16.mxu1 %v1296_v2  ;;  %1129 = vmatprep.subr.bf16.mxu0 %v1298_v4  ;;  %v1301_v7 = vld [vmem:[#allocation5 + $0x88] sm:$0xff]   ;;  %v1304_v10 = vld [vmem:[#allocation5 + $0xd0] sm:$0xff]   ;;  %p1481_p5 = scmp.lt.s32.totalorder %s1016_s14, %s1016_s14 }
  0x4f   :  { %1150 = vmatpush3.bf16.msra.mxu1 %v1297_v3  ;;  %v1305_v11 = vld [vmem:[#allocation5 + $0x90] sm:$0xff]   ;;  %v1306_v12 = vld [vmem:[#allocation5 + $0x58] sm:$0xff]   ;;  %v1310_v16 = vld [vmem:[#allocation5 + $0x60] sm:$0xff]  }
  0x50   :  { %1151 = vmatprep.subr.bf16.mxu1 %v1300_v6  ;;  %v1307_v13 = vld [vmem:[#allocation5 + $0x18] sm:$0xff]   ;;  %v1311_v17 = vld [vmem:[#allocation5 + $0x20] sm:$0xff]   ;;  %v1314_v20 = vld [vmem:[#allocation5 + $0x68] sm:$0xff]  }
  0x51   :  { %1130 = vmatpush3.bf16.msra.mxu0 %v1299_v5  ;;  %v1308_v14 = vld [vmem:[#allocation5 + $0xd8] sm:$0xff]   ;;  %v1312_v18 = vld [vmem:[#allocation5 + $0xe0] sm:$0xff]   ;;  %v1315_v21 = vld [vmem:[#allocation5 + $0x28] sm:$0xff]  }
  0x52   :  { %1131 = vmatprep.subr.bf16.mxu0 %v1302_v8  ;;  %v1309_v15 = vld [vmem:[#allocation5 + $0x98] sm:$0xff]   ;;  %v1313_v19 = vld [vmem:[#allocation5 + $0xa0] sm:$0xff]   ;;  %v1316_v22 = vld [vmem:[#allocation5 + $0xe8] sm:$0xff]  }
  0x53   :  { %1152 = vmatpush3.bf16.msra.mxu1 %v1301_v7  ;;  %v1317_v23 = vld [vmem:[#allocation5 + $0xa8] sm:$0xff]   ;;  %v1318_v24 = vld [vmem:[#allocation5 + $0x70] sm:$0xff]   ;;  %v1322_v28 = vld [vmem:[#allocation5 + $0x78] sm:$0xff]  }
  0x54   :  { %1153 = vmatprep.subr.bf16.mxu1 %v1304_v10  ;;  %v1319_v25 = vld [vmem:[#allocation5 + $0x30] sm:$0xff]   ;;  %v1323_v29 = vld [vmem:[#allocation5 + $0x38] sm:$0xff]   ;;  %v1325_v31 = vld [vmem:[#allocation2] ss:$28 sps:$4 sm:$0xff]  }
  0x55   :  { %1132 = vmatpush3.bf16.msra.mxu0 %v1303_v9  ;;  %v1320_v26 = vld [vmem:[#allocation5 + $0xf0] sm:$0xff]   ;;  %v1324_v30 = vld [vmem:[#allocation5 + $0xf8] sm:$0xff]   ;;  %v1327_v32 = vld [vmem:[#allocation2 + $0x4] ss:$28 sps:$4 sm:$0xff]  }
  0x56   :  { %1133 = vmatprep.subr.bf16.mxu0 %v1306_v12  ;;  %v1321_v27 = vld [vmem:[#allocation5 + $0xb0] sm:$0xff]   ;;  %v1328_v33 = vld [vmem:[#allocation5 + $0xb8] sm:$0xff]   ;;  %617 = vmatprep.mubr.bf16.mxu0 %v1327_v32  ;;  %v1329_v34 = vld [vmem:[#allocation5 + $0x140] sm:$0xff]  }
  0x57   :  { %1154 = vmatpush3.bf16.msra.mxu1 %v1305_v11  ;;  %v1330_v35 = vld [vmem:[#allocation2 + $0x8] ss:$28 sps:$4 sm:$0xff]   ;;  %v1333_v37 = vld [vmem:[#allocation5 + $0x100] sm:$0xff]   ;;  %v1341_v46 = vld [vmem:[#allocation5 + $0x158] sm:$0xff]  }
  0x58   :  { %1155 = vmatprep.subr.bf16.mxu1 %v1308_v14  ;;  %v1332_v36 = vld [vmem:[#allocation2 + $0xc] ss:$28 sps:$4 sm:$0xff]   ;;  %v1334_v39 = vld [vmem:[#allocation5 + $0x180] sm:$0xff]   ;;  %v1335_v40 = vld [vmem:[#allocation5 + $0x148] sm:$0xff]  }
  0x59   :  { %1134 = vmatpush3.bf16.msra.mxu0 %v1307_v13  ;;  %658 = vmatprep.mubr.bf16.mxu1 %v1332_v36  ;;  %v1336_v41 = vld [vmem:[#allocation5 + $0x108] sm:$0xff]   ;;  %v1338_v43 = vld [vmem:[#allocation5 + $0x150] sm:$0xff]   ;;  %v1342_v47 = vld [vmem:[#allocation5 + $0x118] sm:$0xff]  }
  0x5a   :  { %1135 = vmatprep.subr.bf16.mxu0 %v1310_v16  ;;  %v1337_v42 = vld [vmem:[#allocation5 + $0x188] sm:$0xff]   ;;  %v1339_v44 = vld [vmem:[#allocation5 + $0x110] sm:$0xff]   ;;  %v1343_v48 = vld [vmem:[#allocation5 + $0x198] sm:$0xff]  }
  0x5b   :  { %1156 = vmatpush3.bf16.msra.mxu1 %v1309_v15  ;;  %v1340_v45 = vld [vmem:[#allocation5 + $0x190] sm:$0xff]   ;;  %v1344_v49 = vld [vmem:[#allocation5 + $0x160] sm:$0xff]   ;;  %v1347_v52 = vld [vmem:[#allocation5 + $0x168] sm:$0xff]  }
  0x5c   :  { %1157 = vmatprep.subr.bf16.mxu1 %v1312_v18  ;;  %v1345_v50 = vld [vmem:[#allocation5 + $0x120] sm:$0xff]   ;;  %v1348_v53 = vld [vmem:[#allocation5 + $0x128] sm:$0xff]   ;;  %v1350_v55 = vld [vmem:[#allocation5 + $0x170] sm:$0xff]  }
  0x5d   :  { %1136 = vmatpush3.bf16.msra.mxu0 %v1311_v17  ;;  %v1346_v51 = vld [vmem:[#allocation5 + $0x1a0] sm:$0xff]   ;;  %v1349_v54 = vld [vmem:[#allocation5 + $0x1a8] sm:$0xff]   ;;  %v1351_v56 = vld [vmem:[#allocation5 + $0x130] sm:$0xff]  }
  0x5e   :  { %1137 = vmatprep.subr.bf16.mxu0 %v1314_v20  ;;  %v1352_v57 = vld [vmem:[#allocation5 + $0x1b0] sm:$0xff]   ;;  %v1357_v58 = vld [vmem:[#allocation2 + $0x14] ss:$28 sps:$4 sm:$0xff]   ;;  %v1360_v0 = vld [vmem:[#allocation7] sm:$0xff]  }
  0x5f   :  { %1158 = vmatpush3.bf16.msra.mxu1 %v1313_v19  ;;  %v1353_v59 = vld [vmem:[#allocation5 + $0x178] sm:$0xff]   ;;  %v1361_v1 = vld [vmem:[#allocation8] sm:$0xff]   ;;  %v1362_v2 = vld [vmem:[#allocation7 + $0x8] sm:$0xff]  }
  0x60   :  { %1159 = vmatprep.subr.bf16.mxu1 %v1316_v22  ;;  %v1354_v60 = vld [vmem:[#allocation5 + $0x138] sm:$0xff]   ;;  %v1363_v3 = vld [vmem:[#allocation8 + $0x8] sm:$0xff]   ;;  %v1364_v4 = vld [vmem:[#allocation7 + $0x10] sm:$0xff]  }
  0x61   :  { %1138 = vmatpush3.bf16.msra.mxu0 %v1315_v21  ;;  %v1358_v61 = vld [vmem:[#allocation5 + $0x1b8] sm:$0xff]   ;;  %v1365_v5 = vld [vmem:[#allocation8 + $0x10] sm:$0xff]   ;;  %v1368_v8 = vld [vmem:[#allocation7 + $0x20] sm:$0xff]  }
  0x62   :  { %1139 = vmatprep.subr.bf16.mxu0 %v1318_v24  ;;  %v1355_v62 = vld [vmem:[#allocation2 + $0x10] ss:$28 sps:$4 sm:$0xff]   ;;  %v1359_v63 = vld [vmem:[#allocation2 + $0x18] ss:$28 sps:$4 sm:$0xff]   ;;  %v1370_v10 = vld [vmem:[#allocation7 + $0x28] sm:$0xff]  }
  0x63   :  { %1160 = vmatpush3.bf16.msra.mxu1 %v1317_v23  ;;  %v1366_v6 = vld [vmem:[#allocation7 + $0x18] sm:$0xff]   ;;  %v1369_v9 = vld [vmem:[#allocation8 + $0x20] sm:$0xff]   ;;  %v1371_v11 = vld [vmem:[#allocation8 + $0x28] sm:$0xff]  }
  0x64   :  { %1161 = vmatprep.subr.bf16.mxu1 %v1320_v26  ;;  %v1367_v7 = vld [vmem:[#allocation8 + $0x18] sm:$0xff]   ;;  %v1372_v12 = vld [vmem:[#allocation7 + $0x30] sm:$0xff]   ;;  %v1045_v17 = vld [vmem:[%s1718_s2] ss:$0 sm:$0xff] }
  0x65   :  { %1140 = vmatpush3.bf16.msra.mxu0 %v1319_v25  ;;  %v1373_v13 = vld [vmem:[#allocation8 + $0x30] sm:$0xff]   ;;  %v1374_v14 = vld [vmem:[#allocation7 + $0x38] sm:$0xff]  }
  0x66   :  { %1141 = vmatprep.subr.bf16.mxu0 %v1322_v28  ;;  %v1375_v15 = vld [vmem:[#allocation8 + $0x38] sm:$0xff]  }
  0x67   :  { %1162 = vmatpush3.bf16.msra.mxu1 %v1321_v27 }
  0x68   :  { %1163 = vmatprep.subr.bf16.mxu1 %v1324_v30 }
  0x69   :  { %1142 = vmatpush3.bf16.msra.mxu0 %v1323_v29 }
  0x6a   :  { %1171 = vmatprep.subr.bf16.mxu0 %v1329_v34 }
  0x6b   :  { %1164 = vmatpush3.bf16.msra.mxu1 %v1328_v33 }
  0x6c   :  { %618 = vmatmul.mubr.bf16.vlgmr.msra.gmra.mrb[0].mxu0 %v1325_v31  ;;  %1220 = vmatprep.subr.bf16.mxu1 %v1538_v38 }
  0x6d   :  { %1172 = vmatpush3.bf16.msra.mxu0 %v1333_v37  ;;  %699 = vmatprep.mubr.bf16.mxu0 %v1357_v58 }
  0x6e   :  { %659 = vmatmul.mubr.bf16.vlgmr.msra.gmra.mrb[0].mxu1 %v1330_v35  ;;  %1173 = vmatprep.subr.bf16.mxu0 %v1335_v40 }
  0x6f   :  { %1221 = vmatpush3.bf16.msra.mxu1 %v1334_v39  ;;  %1236 = vmatprep.mubr.msk.bf16.mxu1 %vm1539_vm0, %v1538_v38 }
  0x70   :  { %1222 = vmatprep.subr.bf16.mxu1 %v1538_v38 }
  0x71   :  { %1174 = vmatpush3.bf16.msra.mxu0 %v1336_v41 }
  0x72   :  { %1175 = vmatprep.subr.bf16.mxu0 %v1338_v43 }
  0x73   :  { %1223 = vmatpush3.bf16.msra.mxu1 %v1337_v42 }
  0x74   :  { %1224 = vmatprep.subr.bf16.mxu1 %v1538_v38 }
  0x75   :  { %1176 = vmatpush3.bf16.msra.mxu0 %v1339_v44 }
  0x76   :  { %1177 = vmatprep.subr.bf16.mxu0 %v1341_v46 }
  0x77   :  { %1225 = vmatpush3.bf16.msra.mxu1 %v1340_v45 }
  0x78   :  { %1226 = vmatprep.subr.bf16.mxu1 %v1538_v38 }
  0x79   :  { %1178 = vmatpush3.bf16.msra.mxu0 %v1342_v47 }
  0x7a   :  { %1179 = vmatprep.subr.bf16.mxu0 %v1344_v49 }
  0x7b   :  { %1227 = vmatpush3.bf16.msra.mxu1 %v1343_v48 }
  0x7c   :  { %1228 = vmatprep.subr.bf16.mxu1 %v1538_v38 }
  0x7d   :  { %1180 = vmatpush3.bf16.msra.mxu0 %v1345_v50 }
  0x7e   :  { %1181 = vmatprep.subr.bf16.mxu0 %v1347_v52 }
  0x7f   :  { %1229 = vmatpush3.bf16.msra.mxu1 %v1346_v51 }
  0x80   :  { %1230 = vmatprep.subr.bf16.mxu1 %v1538_v38 }
  0x81   :  { %1182 = vmatpush3.bf16.msra.mxu0 %v1348_v53 }
  0x82   :  { %1183 = vmatprep.subr.bf16.mxu0 %v1350_v55 }
  0x83   :  { %1231 = vmatpush3.bf16.msra.mxu1 %v1349_v54 }
  0x84   :  { %1232 = vmatprep.subr.bf16.mxu1 %v1538_v38 }
  0x85   :  { %1184 = vmatpush3.bf16.msra.mxu0 %v1351_v56 }
  0x86   :  { %1185 = vmatprep.subr.bf16.mxu0 %v1353_v59 }
  0x87   :  { %1233 = vmatpush3.bf16.msra.mxu1 %v1352_v57 }
  0x88   :  { %1234 = vmatprep.subr.bf16.mxu1 %v1538_v38 }
  0x89   :  { %1186 = vmatpush3.bf16.msra.mxu0 %v1354_v60 }
  0x8a   :  { %1240 = vmatprep.subr.bf16.mxu0 %v1538_v38 }
  0x8b   :  { %1235 = vmatpush3.bf16.msra.mxu1 %v1358_v61 }
  0x8c   :  { %1260 = vmatprep.subr.bf16.mxu1 %v1538_v38  ;;  %700 = vmatmul.mubr.bf16.vlgmr.msra.gmra.mrb[4].mxu0 %v1355_v62 }
  0x8d   :  { %1256 = vmatprep.mubr.msk.bf16.mxu0 %vm1539_vm0, %v1538_v38  ;;  %1241 = vmatpush3.bf16.msra.mxu0 %v1360_v0 }
  0x8e   :  { %1237 = vmatmul.mubr.bf16.vlgmr.msra.gmra.mrb[4].mxu1 %v1359_v63  ;;  %1242 = vmatprep.subr.bf16.mxu0 %v1538_v38 }
  0x8f   :  { %1276 = vmatprep.mubr.msk.bf16.mxu1 %vm1539_vm0, %v1538_v38  ;;  %1261 = vmatpush3.bf16.msra.mxu1 %v1361_v1 }
  0x90   :  { %1262 = vmatprep.subr.bf16.mxu1 %v1538_v38 }
  0x91   :  { %1243 = vmatpush3.bf16.msra.mxu0 %v1362_v2 }
  0x92   :  { %1244 = vmatprep.subr.bf16.mxu0 %v1538_v38 }
  0x93   :  { %1263 = vmatpush3.bf16.msra.mxu1 %v1363_v3 }
  0x94   :  { %1264 = vmatprep.subr.bf16.mxu1 %v1538_v38 }
  0x95   :  { %1245 = vmatpush3.bf16.msra.mxu0 %v1364_v4 }
  0x96   :  { %1246 = vmatprep.subr.bf16.mxu0 %v1538_v38 }
  0x97   :  { %1265 = vmatpush3.bf16.msra.mxu1 %v1365_v5 }
  0x98   :  { %1266 = vmatprep.subr.bf16.mxu1 %v1538_v38 }
  0x99   :  { %1247 = vmatpush3.bf16.msra.mxu0 %v1366_v6 }
  0x9a   :  { %1248 = vmatprep.subr.bf16.mxu0 %v1538_v38 }
  0x9b   :  { %1267 = vmatpush3.bf16.msra.mxu1 %v1367_v7 }
  0x9c   :  { %1268 = vmatprep.subr.bf16.mxu1 %v1538_v38 }
  0x9d   :  { %1249 = vmatpush3.bf16.msra.mxu0 %v1368_v8  ;;  %v1109_v8 = vld [vmem:[%s1720_s4] ss:$0 sm:$0xff]  ;;  %s1476_s4 = scalar_lea.vmem %s1016_s14, 256 }
  0x9e   :  { %1250 = vmatprep.subr.bf16.mxu0 %v1538_v38  ;;  %p1477_p4 = scmp.ne.s32.totalorder %s1016_s14, %s1476_s4  ;;  %p1482_p6 = scmp.lt.s32.totalorder %s1476_s4, %s1476_s4 }
  0x9f   :  { %1269 = vmatpush3.bf16.msra.mxu1 %v1369_v9  ;;  %v1118_v9 = vld [vmem:[%s1722_s6] ss:$0 sm:$0xff] }
  0xa0   :  { %1270 = vmatprep.subr.bf16.mxu1 %v1538_v38  ;;  %p1483_p7 = por %p1482_p6, %p1481_p5 }
  0xa1   :  { %1251 = vmatpush3.bf16.msra.mxu0 %v1370_v10 }
  0xa2   :  { %1252 = vmatprep.subr.bf16.mxu0 %v1538_v38  ;;  %p1484_p8 = pnand %p1483_p7, %p1477_p4 }
  0xa3   :  { %1271 = vmatpush3.bf16.msra.mxu1 %v1371_v11 }
  0xa4   :  { %1272 = vmatprep.subr.bf16.mxu1 %v1538_v38 }
  0xa5   :  { %1253 = vmatpush3.bf16.msra.mxu0 %v1372_v12 }
  0xa6   :  { %1254 = vmatprep.subr.bf16.mxu0 %v1538_v38 }
  0xa7   :  { %1273 = vmatpush3.bf16.msra.mxu1 %v1373_v13 }
  0xa8   :  { %1274 = vmatprep.subr.bf16.mxu1 %v1538_v38 }
  0xa9   :  { %1255 = vmatpush3.bf16.msra.mxu0 %v1374_v14 }
  0xab   :  { %1275 = vmatpush3.bf16.msra.mxu1 %v1375_v15 }
 0x13f   :  { %v1143_v16 = vpop.f32.mrb[0].mxu0 }
 0x140   :  { %v1144_v18 = vpop.f32.mrb[1].mxu0 }
 0x141   :  { %v1145_v19 = vadd.f32 %v1144_v18, %v1143_v16  ;;  %v1146_v20 = vpop.f32.mrb[2].mxu0  ;;  %v1165_v21 = vpop.f32.mrb[0].mxu1 }
 0x142   :  { %v1147_v22 = vpop.f32.mrb[3].mxu0  ;;  %v1166_v25 = vpop.f32.mrb[1].mxu1 }
 0x143   :  { %v620_v23 = vadd.f32 %v1145_v19, %v1045_v17  ;;  %v1148_v24 = vadd.f32 %v1147_v22, %v1146_v20  ;;  %v1167_v26 = vadd.f32 %v1166_v25, %v1165_v21  ;;  %v1168_v27 = vpop.f32.mrb[2].mxu1 }
 0x144   :  { %v1169_v29 = vpop.f32.mrb[3].mxu1 }
 0x145   :  { %v623_v28 = vadd.f32 %v1148_v24, %v1045_v17  ;;  %v661_v30 = vadd.f32 %v1167_v26, %v620_v23  ;;  %v1170_v31 = vadd.f32 %v1169_v29, %v1168_v27 }
 0x147   :  { %v664_v32 = vadd.f32 %v1170_v31, %v623_v28 }
 0x15f   :  { %v1187_v33 = vpop.f32.mrb[4].mxu0 }
 0x160   :  { %v1188_v34 = vpop.f32.mrb[5].mxu0 }
 0x161   :  { %v742_v35 = vpop.f32.mrb[4].mxu1  ;;  %v1189_v36 = vadd.f32 %v1188_v34, %v1187_v33  ;;  %v1190_v37 = vpop.f32.mrb[6].mxu0 }
 0x162   :  { %v1238_v38 = vpop.f32.mrb[5].mxu1  ;;  %v1191_v39 = vpop.f32.mrb[7].mxu0 }
 0x163   :  { %v745_v40 = vpop.f32.mrb[6].mxu1  ;;  %v702_v41 = vadd.f32 %v1189_v36, %v661_v30  ;;  %v1192_v42 = vadd.f32 %v1191_v39, %v1190_v37 }
 0x164   :  { %v1239_v43 = vpop.f32.mrb[7].mxu1 }
 0x165   :  { %v743_v44 = vadd.f32 %v742_v35, %v702_v41  ;;  %v705_v45 = vadd.f32 %v1192_v42, %v664_v32 }
 0x167   :  { %v751_v46 = vmin.f32 %v743_v44, 20.0  ;;  %v746_v47 = vadd.f32 %v745_v40, %v705_v45  ;;  %vm749_vm3 = vcmp.gt.f32.partialorder %v743_v44, 20.0 }
 0x169   :  { %v753_v48 = vmul.f32 1.442695, %v751_v46  ;;  %v752_v49 = vmin.f32 %v746_v47, 20.0  ;;  %vm750_vm4 = vcmp.gt.f32.partialorder %v746_v47, 20.0 }
 0x16b   :  { %1376 = vpow2.f32 %v753_v48  ;;  %v755_v50 = vmul.f32 1.442695, %v752_v49 }
 0x16d   :  { %1378 = vpow2.f32 %v755_v50 }
 0x175   :  { %v1377_v51 = vpop.eup %1376 }
 0x176   :  { %v757_v52 = vadd.f32 1.0, %v1377_v51  ;;  %v760_v55 = vmul.f32 -0.5, %v1377_v51  ;;  %v763_v58 = vand.u32 2147483647, %v1377_v51 }
 0x177   :  { %v1379_v53 = vpop.eup %1378 }
 0x178   :  { %1380 = vlog2.f32 %v757_v52  ;;  %v766_v54 = vadd.f32 1.0, %v1379_v53  ;;  %v769_v56 = vmul.f32 -0.5, %v1379_v53  ;;  %v761_v57 = vadd.f32 1.0, %v760_v55 }
 0x179   :  { %v772_v61 = vand.u32 2147483647, %v1379_v53  ;;  %vm764_vm1 = vcmp.lt.f32.partialorder %v763_v58, 0.0004427343 }
 0x17a   :  { %1382 = vlog2.f32 %v766_v54  ;;  %v770_v59 = vadd.f32 1.0, %v769_v56  ;;  %v762_v63 = vmul.f32 %v1377_v51, %v761_v57 }
 0x17b   :  { %vm773_vm2 = vcmp.lt.f32.partialorder %v772_v61, 0.0004427343 }
 0x17c   :  { %v771_v3 = vmul.f32 %v1379_v53, %v770_v59 }
 0x182   :  { %v1381_v60 = vpop.eup %1380 }
 0x183   :  { %v759_v62 = vmul.f32 0.6931472, %v1381_v60 }
 0x184   :  { %v1383_v0 = vpop.eup %1382 }
 0x185   :  { %v765_v1 = vsel %vm764_vm1, %v762_v63, %v759_v62  ;;  %v768_v2 = vmul.f32 0.6931472, %v1383_v0 }
 0x186   :  { %v775_v5 = vsel %vm749_vm3, %v743_v44, %v765_v1 }
 0x187   :  { %v774_v4 = vsel %vm773_vm2, %v771_v3, %v768_v2 }
 0x188   :  { %v776_v6 = vsel %vm750_vm4, %v746_v47, %v774_v4 }
 0x189   :  { %v777_v7 = vpack.c.bf16 %v776_v6, %v775_v5 }
 0x18b   :  { %1257 = vmatmul.mubr.bf16.vlgmr.msra.gmra.mrb[8].mxu0 %v777_v7  ;;  %1277 = vmatmul.mubr.bf16.vlgmr.msra.gmra.mrb[8].mxu1 %v777_v7 }
 0x25e   :  { %v883_v10 = vpop.f32.mrb[8].mxu0  ;;  %v997_v11 = vpop.f32.mrb[8].mxu1 }
 0x25f   :  { %v884_v12 = vadd.f32 %v1109_v8, %v883_v10  ;;  %v998_v13 = vadd.f32 %v1118_v9, %v997_v11  ;;  %v1258_v14 = vpop.f32.mrb[9].mxu0  ;;  %v1278_v15 = vpop.f32.mrb[9].mxu1 }
 0x260   :  { %v886_v16 = vpop.f32.mrb[10].mxu0  ;;  %v1000_v17 = vpop.f32.mrb[10].mxu1 }
 0x261   :  { %890 = vst [vmem:[#allocation10] sm:$0xff] %v884_v12  ;;  %v1004_v18 = vmul.f32 1.442695, %v998_v13  ;;  %v887_v19 = vadd.f32 %v1109_v8, %v886_v16  ;;  %v1001_v20 = vadd.f32 %v1118_v9, %v1000_v17  ;;  %v1259_v21 = vpop.f32.mrb[11].mxu0  ;;  %v1279_v22 = vpop.f32.mrb[11].mxu1 }
 0x263   :  { %1384 = vpow2.f32 %v1004_v18  ;;  %891 = vst [vmem:[#allocation10 + $0x8] sm:$0xff] %v887_v19  ;;  %v1006_v23 = vmul.f32 1.442695, %v1001_v20 }
 0x264   :  { %1487 = shalt.err (!%p1484_p8)
}
 0x265   :  { %s1488_s18 = scalar_lea.hbm %s1723_s7, 256 }
 0x266   :  { %p1489_p9 = scmp.ne.s32.totalorder %s1723_s7, %s1488_s18  ;;  %p1492_p10 = scmp.lt.u32.totalorder %s1488_s18, %s1723_s7 }
 0x268   :  { %p1494_p11 = pnand %p1492_p10, %p1489_p9 }
 0x26a   :  { %1497 = shalt.err (!%p1494_p11)
}
 0x26b   :  { %s1541_s0 = smov 128   ;;  %s1542_s20 = smov 8   ;;  %1386 = vpow2.f32 %v1006_v23 }
 0x26c   :  { %1021 = dma.vmem_to_hbm [thread:$0]  %s1016_s14, 256, %s1723_s7, [#allocation4], %s1541_s0, %s1541_s0, %s1542_s20  }
 0x26d   :  { %s1543_s26 = smov [#allocation11]   ;;  %v1385_v24 = vpop.eup %1384 }
 0x26e   :  { %s1027_s27 = sshll.u32 %s1543_s26, 4  ;;  %1008 = vst [vmem:[#allocation11] sm:$0xff] %v1385_v24  ;;  %s1028_s27 = int_to_ptr.vmem [resolvable:$true] %s1027_s27 }
 0x26f   :  { %s1498_s29 = scalar_lea.vmem %s1028_s27, 256  ;;  %p1503_p13 = scmp.lt.s32.totalorder %s1028_s27, %s1028_s27 }
 0x270   :  { %p1499_p12 = scmp.ne.s32.totalorder %s1028_s27, %s1498_s29  ;;  %p1504_p0 = scmp.lt.s32.totalorder %s1498_s29, %s1498_s29 }
 0x272   :  { %p1505_p1 = por %p1504_p0, %p1503_p13 }
 0x274   :  { %p1506_p2 = pnand %p1505_p1, %p1499_p12 }
 0x275   :  { %v1387_v25 = vpop.eup %1386 }
 0x276   :  { %1009 = vst [vmem:[#allocation11 + $0x8] sm:$0xff] %v1387_v25 }
 0x277   :  { %1509 = shalt.err (!%p1506_p2)
}
 0x278   :  { %s1510_s30 = scalar_lea.hbm %s1724_s8, 256 }
 0x279   :  { %p1511_p3 = scmp.ne.s32.totalorder %s1724_s8, %s1510_s30  ;;  %p1514_p4 = scmp.lt.u32.totalorder %s1510_s30, %s1724_s8 }
 0x27b   :  { %p1516_p5 = pnand %p1514_p4, %p1511_p3 }
 0x27d   :  { %1519 = shalt.err (!%p1516_p5)
}
 0x27e   :  { %1033 = dma.vmem_to_hbm [thread:$0]  %s1028_s27, 256, %s1724_s8, [#allocation12], %s1541_s0, %s1541_s0, %s1542_s20  }
 0x27f   :  { %1526 = dma.done.wait [#allocation4], 256  }
 0x280   :  { %1527 = vsyncadd [#allocation4], 4294967040 }
 0x281   :  { %1528 = dma.done.wait [#allocation12], 256  }
 0x282   :  { %1529 = vsyncadd [#allocation12], 4294967040 }
 0x283   :  { %1040 = vsyncpa [#allocation3], 1 }
 0x284   :  { %1041 = vsyncpa [#allocation6], 1 }
 0x285   :  { %1042 = vsyncpa [#allocation9], 1 }
 0x286   :  { %1043 = vsyncpa [#allocation4], 1 }
 0x287   :  { %1044 = vsyncpa [#allocation12], 1 }

</bundles_post_ra>
